<compile_context>
chip_gen: v5e
topology: v5e:2x2
jax: 0.10.0
libtpu: 0.0.40
codegen_flags: <defaults>
</compile_context>

<pallas_src>
import numpy as np
import jax
import jax.numpy as jnp
from jax import lax
from jax.experimental import pallas as pl
from jax.experimental.pallas import tpu as pltpu


def se_kernel(x_ref, w1_ref, w2t_ref, out_ref):
    """One batch block: x_ref (B_TILE, C, HW); w1 (C/r, C); w2t (C/r, C)."""
    xb = x_ref[...]                                            # (B, C, HW)
    inv_hw = 1.0 / xb.shape[-1]

    # squeeze: global average pool over the spatial (lane) axis -> (B, C)
    s = jnp.sum(xb, axis=-1) * inv_hw                          # (B, C)

    # excitation, batched over all B batch elements in this block.
    # h = s @ w1.T  (contract over C; both operands lane-dense along C,
    # no transpose materialized -- MXU handles the trans_b form).
    h = lax.dot_general(
        s, w1_ref[...],
        dimension_numbers=(((1,), (1,)), ((), ())),
        preferred_element_type=jnp.float32,
        precision=lax.Precision.HIGHEST)                       # (B, C/r)
    h = jnp.maximum(h, 0.0)

    # g = h @ w2.T, with w2 passed pre-transposed as (C/r, C) (lane-dense).
    g = jnp.dot(h, w2t_ref[...],
                preferred_element_type=jnp.float32,
                precision=lax.Precision.HIGHEST)               # (B, C)
    gate = jax.nn.sigmoid(g)

    # scale: broadcast the per-(batch, channel) gate over the spatial lanes.
    out_ref[...] = xb * gate[:, :, None]


def _num_batch_blocks(bs):
    """Use a 2-way parallel batch split only on 2-TensorCore chips (v7x)."""
    if bs % 2 != 0:
        return 1
    try:
        kind = jax.devices()[0].device_kind.lower()
    except Exception:
        return 1
    return 2 if ("v7" in kind or "7x" in kind) else 1


def se_forward(x, w1, w2):
    """x: (bs, C, H, W) f32; w1: (C//r, C); w2: (C, C//r) (PyTorch layouts)."""
    bs, c, H, W = x.shape
    hw = H * W
    c_red = w1.shape[0]

    x_flat = x.reshape(bs, c, hw)
    w2_t = w2.T                       # (C/r, C): one-time host-side transpose

    nblk = _num_batch_blocks(bs)      # 1 on v5e/v6e (single TC), 2 on v7x
    b_tile = bs // nblk

    out = pl.pallas_call(
        se_kernel,
        out_shape=jax.ShapeDtypeStruct((bs, c, hw), jnp.float32),
        grid=(nblk,),
        in_specs=[
            pl.BlockSpec((b_tile, c, hw), lambda b: (b, 0, 0)),   # x batch block
            pl.BlockSpec((c_red, c), lambda b: (0, 0)),           # fc1 weight (out, in)
            pl.BlockSpec((c_red, c), lambda b: (0, 0)),           # fc2 weight, pre-transposed
        ],
        out_specs=pl.BlockSpec((b_tile, c, hw), lambda b: (b, 0, 0)),
        compiler_params=pltpu.CompilerParams(
            dimension_semantics=("parallel",)),
    )(x_flat, w1, w2_t)
    return out.reshape(bs, c, H, W)


def se_reference(x, w1, w2):
    """Pure-JAX reference matching the PyTorch SEBlock forward."""
    y = jnp.mean(x, axis=(2, 3))                                           # (bs, c)
    y = jnp.maximum(jnp.matmul(y, w1.T, precision=lax.Precision.HIGHEST), 0.0)
    y = jax.nn.sigmoid(jnp.matmul(y, w2.T, precision=lax.Precision.HIGHEST))
    return x * y[:, :, None, None]


if __name__ == "__main__":
    bs, c, H, W = 2, 64, 16, 16                # HW = 256 (lane-dense)
    reduction = 16
    c_red = c // reduction                     # 4

    key = jax.random.PRNGKey(0)
    k1, k2, k3 = jax.random.split(key, 3)
    x = jax.random.normal(k1, (bs, c, H, W), dtype=jnp.float32)
    w1 = 0.2 * jax.random.normal(k2, (c_red, c), dtype=jnp.float32)   # Linear(c, c//r).weight
    w2 = 0.2 * jax.random.normal(k3, (c, c_red), dtype=jnp.float32)   # Linear(c//r, c).weight

    out = jax.block_until_ready(se_forward(x, w1, w2))
    ref = jax.block_until_ready(se_reference(x, w1, w2))

    assert out.shape == (bs, c, H, W)
    if not np.allclose(np.asarray(out), np.asarray(ref), atol=1e-5, rtol=1e-5):
        raise AssertionError("Pallas output mismatches JAX reference")
    print("KERNEL_OK")
</pallas_src>

<mosaic_0001>
module attributes {stable_mosaic.version = 11 : i64} {
  func.func @se_kernel(%arg0: i32, %arg1: memref<2x64x256xf32, #tpu.memory_space<vmem>>, %arg2: memref<4x64xf32, #tpu.memory_space<vmem>>, %arg3: memref<4x64xf32, #tpu.memory_space<vmem>>, %arg4: memref<2x64x256xf32, #tpu.memory_space<vmem>>) attributes {dimension_semantics = [#tpu.dimension_semantics<parallel>], iteration_bounds = array<i64: 1>, scalar_prefetch = 0 : i64, scratch_operands = 0 : i64, tpu.core_type = #tpu.core_type<tc>, window_params = [{transform_indices = @transform_0, window_bounds = array<i64: 2, 64, 256>}, {pipeline_mode = #tpu.pipeline_mode<synchronous>, transform_indices = @transform_1, window_bounds = array<i64: 4, 64>}, {pipeline_mode = #tpu.pipeline_mode<synchronous>, transform_indices = @transform_2, window_bounds = array<i64: 4, 64>}, {transform_indices = @transform_3, window_bounds = array<i64: 2, 64, 256>}]} {
    %c0 = arith.constant 0 : index
    %c0_0 = arith.constant 0 : index
    %c0_1 = arith.constant 0 : index
    %0 = vector.load %arg1[%c0, %c0_0, %c0_1] : memref<2x64x256xf32, #tpu.memory_space<vmem>>, vector<2x64x256xf32>
    %cst = arith.constant dense<0.000000e+00> : vector<2x64xf32>
    %1 = vector.multi_reduction <add>, %0, %cst [2] : vector<2x64x256xf32> to vector<2x64xf32>
    %cst_2 = arith.constant 3.906250e-03 : f32
    %2 = vector.broadcast %cst_2 : f32 to vector<2x64xf32>
    %3 = arith.mulf %1, %2 : vector<2x64xf32>
    %c0_3 = arith.constant 0 : index
    %c0_4 = arith.constant 0 : index
    %4 = vector.load %arg2[%c0_3, %c0_4] : memref<4x64xf32, #tpu.memory_space<vmem>>, vector<4x64xf32>
    %cst_5 = arith.constant dense<0.000000e+00> : vector<2x4xf32>
    %5 = tpu.matmul %3, %4, %cst_5 {dimension_numbers = #tpu.dot_dimension_numbers<[1], [1], [0], [0], [0, 0, 1, 0], [], []>, precision = #tpu.contract_precision<fp32>} : vector<2x64xf32>, vector<4x64xf32>, vector<2x4xf32> -> vector<2x4xf32>
    %cst_6 = arith.constant 0.000000e+00 : f32
    %6 = vector.broadcast %cst_6 : f32 to vector<2x4xf32>
    %7 = arith.maximumf %5, %6 : vector<2x4xf32>
    %c0_7 = arith.constant 0 : index
    %c0_8 = arith.constant 0 : index
    %8 = vector.load %arg3[%c0_7, %c0_8] : memref<4x64xf32, #tpu.memory_space<vmem>>, vector<4x64xf32>
    %cst_9 = arith.constant dense<0.000000e+00> : vector<2x64xf32>
    %9 = tpu.matmul %7, %8, %cst_9 {dimension_numbers = #tpu.dot_dimension_numbers<[1], [0], [0], [1], [0, 0, 1, 1], [], []>, precision = #tpu.contract_precision<fp32>} : vector<2x4xf32>, vector<4x64xf32>, vector<2x64xf32> -> vector<2x64xf32>
    %10 = arith.negf %9 : vector<2x64xf32>
    %11 = math.exp %10 : vector<2x64xf32>
    %cst_10 = arith.constant 1.000000e+00 : f32
    %12 = vector.broadcast %cst_10 : f32 to vector<2x64xf32>
    %13 = arith.addf %12, %11 : vector<2x64xf32>
    %14 = arith.divf %12, %13 : vector<2x64xf32>
    %15 = vector.shape_cast %14 : vector<2x64xf32> to vector<2x64x1xf32>
    %16 = vector.broadcast %15 : vector<2x64x1xf32> to vector<2x64x256xf32>
    %17 = arith.mulf %0, %16 : vector<2x64x256xf32>
    %c0_11 = arith.constant 0 : index
    %c0_12 = arith.constant 0 : index
    %c0_13 = arith.constant 0 : index
    %18 = vector.load %arg4[%c0_11, %c0_12, %c0_13] : memref<2x64x256xf32, #tpu.memory_space<vmem>>, vector<2x64x256xf32>
    tpu.vector_store %arg4[%c0_11, %c0_12, %c0_13], %17 {strides = array<i32>} : memref<2x64x256xf32, #tpu.memory_space<vmem>>, vector<2x64x256xf32>,
    return
  }
  func.func @transform_0(%arg0: i32) -> (i32, i32, i32) {
    %c0_i32 = arith.constant 0 : i32
    %c0_i32_0 = arith.constant 0 : i32
    %c0_i32_1 = arith.constant 0 : i32
    return %arg0, %c0_i32, %c0_i32_0 : i32, i32, i32
  }
  func.func @transform_1(%arg0: i32) -> (i32, i32) {
    %c0_i32 = arith.constant 0 : i32
    %c0_i32_0 = arith.constant 0 : i32
    %c0_i32_1 = arith.constant 0 : i32
    return %c0_i32, %c0_i32_0 : i32, i32
  }
  func.func @transform_2(%arg0: i32) -> (i32, i32) {
    %c0_i32 = arith.constant 0 : i32
    %c0_i32_0 = arith.constant 0 : i32
    %c0_i32_1 = arith.constant 0 : i32
    return %c0_i32, %c0_i32_0 : i32, i32
  }
  func.func @transform_3(%arg0: i32) -> (i32, i32, i32) {
    %c0_i32 = arith.constant 0 : i32
    %c0_i32_0 = arith.constant 0 : i32
    %c0_i32_1 = arith.constant 0 : i32
    return %arg0, %c0_i32, %c0_i32_0 : i32, i32, i32
  }
}

</mosaic_0001>

<bundles_post_ra>
// kernel: tpu_custom_call.1
= control target key start
LH: loop header
LB: loop body
LE: loop exit
PB: predicated region body
PF: predicated region fallthrough
CT: control target
= control target key end

     0   :  { %8 = vsyncpa [#allocation3], 0  ;;  %s1042_s0 = inlined_call_operand.hbm [shape: f32[2,64,256], index: 0, kind: input, shape index: {}]   ;;  %s1043_s1 = inlined_call_operand.hbm [shape: f32[4,64], index: 1, kind: input, shape index: {}]   ;;  %s1044_s2 = inlined_call_operand.hbm [shape: f32[4,64], index: 2, kind: input, shape index: {}]   ;;  %s1045_s3 = inlined_call_operand.hbm [shape: f32[2,64,256], index: 3, kind: output, shape index: {}]  }
   0x1   :  { %9 = vsyncpa [#allocation6], 0  ;;  %s29_s14 = sshll.u32 %s1043_s1, 4  ;;  %s30_s14 = int_to_ptr.hbm [resolvable:$true] %s29_s14 }
   0x2   :  { %10 = vsyncpa [#allocation4], 0  ;;  %s858_s15 = smov [#allocation5]   ;;  %s15_s19 = sshll.u32 %s1042_s0, 4  ;;  %s16_s19 = int_to_ptr.hbm [resolvable:$true] %s15_s19 }
   0x3   :  { %s31_s16 = sshll.u32 %s858_s15, 4  ;;  %s859_s20 = smov [#allocation2]   ;;  %s32_s16 = int_to_ptr.vmem [resolvable:$true] %s31_s16 }
   0x4   :  { %34 = dma.hbm_to_vmem [thread:$0]  %s30_s14, 64, %s32_s16, [#allocation6]  }
   0x5   :  { %s17_s21 = sshll.u32 %s859_s20, 4  ;;  %s860_s22 = smov 256   ;;  %s18_s21 = int_to_ptr.vmem [resolvable:$true] %s17_s21 }
   0x6   :  { %s861_s23 = smov 16   ;;  %s40_s25 = sshll.u32 %s1044_s2, 4  ;;  %s41_s25 = int_to_ptr.hbm [resolvable:$true] %s40_s25 }
   0x7   :  { %23 = dma.hbm_to_vmem [thread:$0]  %s16_s19, 4096, %s18_s21, [#allocation3], %s860_s22, %s860_s22, %s861_s23  }
   0x8   :  { %s862_s26 = smov [#allocation7]  }
   0x9   :  { %s42_s27 = sshll.u32 %s862_s26, 4  ;;  %s43_s27 = int_to_ptr.vmem [resolvable:$true] %s42_s27 }
   0xa   :  { %45 = dma.hbm_to_vmem [thread:$0]  %s41_s25, 64, %s43_s27, [#allocation6]  }
   0xb   :  { %852 = dma.done.wait [#allocation3], 4096  }
   0xc   :  { %853 = vsyncadd [#allocation3], 4294963200 }
   0xd   :  { %854 = dma.done.wait [#allocation6], 128  }
   0xe   :  { %855 = vsyncadd [#allocation6], 4294967168  ;;  %v896_v0 = vld [vmem:[#allocation2 + $0x80] sm:$0xff]  ;;  %v898_v1 = vld [vmem:[#allocation2 + $0x88] sm:$0xff]  ;;  %vm219_vm0 = vcmask 523264   ;;  %vm176_vm1 = vcmask 130112  }
   0xf   :  { %v900_v2 = vld [vmem:[#allocation2] sm:$0xff]  ;;  %v114_v3 = vadd.f32 %v898_v1, %v896_v0  ;;  %v904_v4 = vld [vmem:[#allocation2 + $0x8] sm:$0xff]  ;;  %v914_v9 = vld [vmem:[#allocation2 + $0x90] sm:$0xff]  ;;  %vm180_vm2 = vcmask 195712   ;;  %vm184_vm3 = vcmask 261312   ;;  %vm188_vm4 = vcmask 326912  }
  0x10   :  { %v906_v5 = vld [vmem:[#allocation2 + $0x20] sm:$0xff]  ;;  %v908_v6 = vld [vmem:[#allocation2 + $0x28] sm:$0xff]  ;;  %v90_v7 = vadd.f32 %v904_v4, %v900_v2  ;;  %v916_v10 = vld [vmem:[#allocation2 + $0x98] sm:$0xff]  ;;  %vm192_vm5 = vcmask 392512   ;;  %vm196_vm6 = vcmask 458112   ;;  %vm200_vm7 = vcmask 523712  }
  0x11   :  { %v96_v8 = vadd.f32 %v908_v6, %v906_v5  ;;  %115 = vadd.xlane.f32.xlu1 %v114_v3  ;;  %v918_v11 = vld [vmem:[#allocation2 + $0x10] sm:$0xff]  ;;  %v920_v12 = vld [vmem:[#allocation2 + $0x18] sm:$0xff]  ;;  %v922_v13 = vld [vmem:[#allocation2 + $0xa0] sm:$0xff]  ;;  %v117_v15 = vadd.f32 %v916_v10, %v914_v9  ;;  %v1046_v3 = vlaneseq  ;;  %vm217_vm8 = vcmask 1041409   ;;  %s863_s0 = smov [#allocation8]   ;;  %s714_s30 = sshll.u32 %s1045_s3, 4  ;;  %s715_s30 = int_to_ptr.hbm [resolvable:$true] %s714_s30 }
  0x12   :  { %91 = vadd.xlane.f32.xlu0 %v90_v7  ;;  %v924_v14 = vld [vmem:[#allocation2 + $0xa8] sm:$0xff]  ;;  %v93_v16 = vadd.f32 %v920_v12, %v918_v11  ;;  %v932_v18 = vld [vmem:[#allocation2 + $0xb0] sm:$0xff]  ;;  %v934_v19 = vld [vmem:[#allocation2 + $0xb8] sm:$0xff]  ;;  %vm377_vm9 = vcmask 1043456   ;;  %vm373_vm10 = vcmask 31744   ;;  %s712_s2 = sshll.u32 %s863_s0, 4  ;;  %s713_s2 = int_to_ptr.vmem [resolvable:$true] %s712_s2 }
  0x13   :  { %97 = vadd.xlane.f32.xlu2 %v96_v8  ;;  %v120_v17 = vadd.f32 %v924_v14, %v922_v13  ;;  %v936_v20 = vld [vmem:[#allocation2 + $0x30] sm:$0xff]  ;;  %v938_v21 = vld [vmem:[#allocation2 + $0x38] sm:$0xff]  ;;  %v940_v22 = vld [vmem:[#allocation2 + $0x40] sm:$0xff]  ;;  %v123_v24 = vadd.f32 %v934_v19, %v932_v18  ;;  %v172_v7 = vand.u32 127, %v1046_v3 }
  0x14   :  { %v942_v23 = vld [vmem:[#allocation2 + $0x48] sm:$0xff]  ;;  %v99_v25 = vadd.f32 %v938_v21, %v936_v20  ;;  %v950_v27 = vld [vmem:[#allocation2 + $0x50] sm:$0xff]  ;;  %v952_v28 = vld [vmem:[#allocation2 + $0x58] sm:$0xff] }
  0x15   :  { %v102_v26 = vadd.f32 %v942_v23, %v940_v22  ;;  %v954_v29 = vld [vmem:[#allocation2 + $0xc0] sm:$0xff]  ;;  %v956_v30 = vld [vmem:[#allocation2 + $0xc8] sm:$0xff]  ;;  %v958_v31 = vld [vmem:[#allocation2 + $0xd0] sm:$0xff]  ;;  %v105_v33 = vadd.f32 %v952_v28, %v950_v27 }
  0x16   :  { %1049 = vst [vmem:[#allocation12_spill] sm:$0xff] %v958_v31  ;;  %v960_v32 = vld [vmem:[#allocation2 + $0xd8] sm:$0xff]  ;;  %v126_v34 = vadd.f32 %v956_v30, %v954_v29  ;;  %v968_v36 = vld [vmem:[#allocation2 + $0xe0] sm:$0xff]  ;;  %v970_v37 = vld [vmem:[#allocation2 + $0xe8] sm:$0xff] }
  0x17   :  { %1050 = vst [vmem:[#allocation13_spill] sm:$0xff] %v960_v32  ;;  %v129_v35 = vadd.f32 %v960_v32, %v958_v31  ;;  %v972_v38 = vld [vmem:[#allocation2 + $0x60] sm:$0xff]  ;;  %v974_v39 = vld [vmem:[#allocation2 + $0x68] sm:$0xff]  ;;  %v976_v40 = vld [vmem:[#allocation2 + $0x70] sm:$0xff]  ;;  %v132_v42 = vadd.f32 %v970_v37, %v968_v36 }
  0x18   :  { %v978_v41 = vld [vmem:[#allocation2 + $0x78] sm:$0xff]  ;;  %v108_v43 = vadd.f32 %v974_v39, %v972_v38  ;;  %v986_v45 = vld [vmem:[#allocation2 + $0xf0] sm:$0xff]  ;;  %v154_v51 = vld [vmem:[#allocation5] sm:$0xf] }
  0x19   :  { %118 = vadd.xlane.f32.xlu1 %v117_v15  ;;  %v111_v44 = vadd.f32 %v978_v41, %v976_v40  ;;  %v988_v46 = vld [vmem:[#allocation2 + $0xf8] sm:$0xff]  ;;  %v223_v52 = vsel %vm219_vm0, %v154_v51, 0 }
  0x1a   :  { %94 = vadd.xlane.f32.xlu0 %v93_v16  ;;  %v135_v47 = vadd.f32 %v988_v46, %v986_v45  ;;  %v240_v53 = vand.u32 4294901760, %v223_v52 }
  0x1b   :  { %121 = vadd.xlane.f32.xlu2 %v120_v17  ;;  %v174_v17 = vadd.s32 4294967288, %v172_v7 }
  0x1c   :  { %v267_v55 = vsub.f32 %v223_v52, %v240_v53  ;;  %317 = vmatpush.xpose.msra.mxu3 %v240_v53  ;;  %241 = vmatpush.xpose.msra.mxu0 %v240_v53 }
  0x1e   :  { %v268_v58 = vand.u32 4294901760, %v267_v55  ;;  %294 = vmatpush.xpose.msra.mxu2 %v267_v55 }
  0x20   :  { %v269_v59 = vsub.f32 %v267_v55, %v268_v58  ;;  %343 = vmatpush.xpose.msrb.mxu0 %v268_v58 }
  0x21   :  { %124 = vadd.xlane.f32.xlu1 %v123_v24 }
  0x22   :  { %100 = vadd.xlane.f32.xlu0 %v99_v25  ;;  %v270_v60 = vand.u32 4294901760, %v269_v59  ;;  %v186_v59 = vadd.s32 4294967264, %v172_v7 }
  0x23   :  { %103 = vadd.xlane.f32.xlu2 %v102_v26 }
  0x24   :  { %271 = vmatpush.xpose.msra.mxu1 %v270_v60 }
  0x28   :  { %365 = vmatpush.xpose.msrb.mxu1 %v240_v53 }
  0x29   :  { %106 = vadd.xlane.f32.xlu1 %v105_v33 }
  0x2a   :  { %127 = vadd.xlane.f32.xlu0 %v126_v34  ;;  %v178_v34 = vadd.s32 4294967280, %v172_v7 }
  0x2b   :  { %130 = vadd.xlane.f32.xlu2 %v129_v35 }
  0x31   :  { %133 = vadd.xlane.f32.xlu1 %v132_v42 }
  0x32   :  { %109 = vadd.xlane.f32.xlu0 %v108_v43  ;;  %v182_v43 = vadd.s32 4294967272, %v172_v7 }
  0x33   :  { %112 = vadd.xlane.f32.xlu2 %v111_v44 }
  0x3a   :  { %136 = vadd.xlane.f32.xlu0 %v135_v47 }
  0x84   :  { %v116_v48 = vpop.xlane.xlu1 %115 }
  0x85   :  { %v92_v49 = vpop.xlane.xlu0 %91  ;;  %v146_v25 = vmul.f32 0.00390625, %v116_v48 }
  0x86   :  { %v98_v50 = vpop.xlane.xlu2 %97  ;;  %v138_v26 = vmul.f32 0.00390625, %v92_v49 }
  0x87   :  { %v140_v35 = vmul.f32 0.00390625, %v98_v50  ;;  %v202_v51 = vperm.slane %v146_v25, %v172_v7 }
  0x88   :  { %v173_v52 = vperm.slane %v138_v26, %v172_v7 }
  0x89   :  { %v179_v58 = vperm.slane %v140_v35, %v178_v34 }
  0x8c   :  { %v119_v54 = vpop.xlane.xlu1 %118 }
  0x8d   :  { %v95_v56 = vpop.xlane.xlu0 %94  ;;  %v147_v33 = vmul.f32 0.00390625, %v119_v54  ;;  %v190_v54 = vadd.s32 4294967256, %v172_v7 }
  0x8e   :  { %v122_v57 = vpop.xlane.xlu2 %121  ;;  %v139_v24 = vmul.f32 0.00390625, %v95_v56 }
  0x8f   :  { %v148_v47 = vmul.f32 0.00390625, %v122_v57  ;;  %v203_v53 = vperm.slane %v147_v33, %v174_v17 }
  0x90   :  { %v175_v42 = vperm.slane %v139_v24, %v174_v17 }
  0x91   :  { %v205_v32 = vperm.slane %v148_v47, %v178_v34  ;;  %v204_v25 = vsel %vm176_vm1, %v203_v53, %v202_v51 }
  0x92   :  { %v177_v48 = vsel %vm176_vm1, %v175_v42, %v173_v52 }
  0x93   :  { %v206_v34 = vsel %vm180_vm2, %v205_v32, %v204_v25 }
  0x94   :  { %v125_v61 = vpop.xlane.xlu1 %124 }
  0x95   :  { %v101_v62 = vpop.xlane.xlu0 %100  ;;  %v149_v55 = vmul.f32 0.00390625, %v125_v61 }
  0x96   :  { %v104_v63 = vpop.xlane.xlu2 %103  ;;  %v141_v44 = vmul.f32 0.00390625, %v101_v62  ;;  %v194_v62 = vadd.s32 4294967248, %v172_v7 }
  0x97   :  { %v142_v60 = vmul.f32 0.00390625, %v104_v63  ;;  %v207_v17 = vperm.slane %v149_v55, %v182_v43  ;;  %v181_v63 = vsel %vm180_vm2, %v179_v58, %v177_v48 }
  0x98   :  { %v183_v49 = vperm.slane %v141_v44, %v182_v43 }
  0x99   :  { %v208_v52 = vsel %vm184_vm3, %v207_v17, %v206_v34  ;;  %v372_v17 = vld [vmem:[#allocation7] sm:$0xf] }
  0x9a   :  { %v185_v35 = vsel %vm184_vm3, %v183_v49, %v181_v63 }
  0x9c   :  { %v107_v8 = vpop.xlane.xlu1 %106 }
  0x9d   :  { %v128_v15 = vpop.xlane.xlu0 %127  ;;  %v143_v50 = vmul.f32 0.00390625, %v107_v8  ;;  %v198_v8 = vadd.s32 4294967240, %v172_v7 }
  0x9e   :  { %v131_v16 = vpop.xlane.xlu2 %130  ;;  %v150_v3 = vmul.f32 0.00390625, %v128_v15  ;;  %v187_v15 = vperm.slane %v142_v60, %v186_v59 }
  0x9f   :  { %v151_v61 = vmul.f32 0.00390625, %v131_v16  ;;  %v191_v42 = vperm.slane %v143_v50, %v190_v54 }
  0xa0   :  { %v209_v26 = vperm.slane %v150_v3, %v186_v59  ;;  %v189_v16 = vsel %vm188_vm4, %v187_v15, %v185_v35 }
  0xa1   :  { %v211_v51 = vperm.slane %v151_v61, %v190_v54  ;;  %v193_v55 = vsel %vm192_vm5, %v191_v42, %v189_v16  ;;  %v379_v61 = vsel %vm377_vm9, %v372_v17, 0 }
  0xa2   :  { %v210_v43 = vsel %vm188_vm4, %v209_v26, %v208_v52  ;;  %v396_v63 = vand.u32 4294901760, %v379_v61 }
  0xa3   :  { %v212_v7 = vsel %vm192_vm5, %v211_v51, %v210_v43 }
  0xa4   :  { %v134_v24 = vpop.xlane.xlu1 %133  ;;  %v423_v15 = vsub.f32 %v379_v61, %v396_v63  ;;  %397 = vmatpush.msrb.mxu2 %v396_v63 }
  0xa5   :  { %v110_v56 = vpop.xlane.xlu0 %109  ;;  %v152_v33 = vmul.f32 0.00390625, %v134_v24 }
  0xa6   :  { %v144_v31 = vmul.f32 0.00390625, %v110_v56  ;;  %v113_v57 = vpop.xlane.xlu2 %112  ;;  %v424_v26 = vand.u32 4294901760, %v423_v15 }
  0xa7   :  { %v145_v44 = vmul.f32 0.00390625, %v113_v57  ;;  %v213_v53 = vperm.slane %v152_v33, %v194_v62 }
  0xa8   :  { %v195_v47 = vperm.slane %v144_v31, %v194_v62  ;;  %v425_v33 = vsub.f32 %v423_v15, %v424_v26 }
  0xa9   :  { %v199_v58 = vperm.slane %v145_v44, %v198_v8  ;;  %v214_v32 = vsel %vm196_vm6, %v213_v53, %v212_v7 }
  0xaa   :  { %v197_v60 = vsel %vm196_vm6, %v195_v47, %v193_v55  ;;  %v426_v35 = vand.u32 4294901760, %v425_v33 }
  0xab   :  { %v201_v31 = vsel %vm200_vm7, %v199_v58, %v197_v60 }
  0xac   :  { %427 = vmatpush.msrb.mxu3 %v426_v35 }
  0xad   :  { %v137_v3 = vpop.xlane.xlu0 %136 }
  0xae   :  { %v153_v59 = vmul.f32 0.00390625, %v137_v3 }
  0xb0   :  { %v215_v56 = vperm.slane %v153_v59, %v198_v8 }
  0xb2   :  { %v216_v48 = vsel %vm200_vm7, %v215_v56, %v214_v32 }
  0xb3   :  { %v218_v49 = vsel %vm217_vm8, %v216_v48, %v201_v31 }
  0xb4   :  { %v220_v54 = vsel %vm219_vm0, %v218_v49, 0  ;;  %v1051_v49 = vlaneseq }
  0xb5   :  { %v242_v50 = vand.u32 4294901760, %v220_v54 }
  0xb7   :  { %273 = vmatmul.f32.vlgmr.msra.gmra.mxu1 %v242_v50  ;;  %v243_v24 = vsub.f32 %v220_v54, %v242_v50  ;;  %v548_v54 = vshrl.u32 %v1051_v49, 7 }
  0xb8   :  { %473 = vmatpush.msra.mxu1 %v396_v63 }
  0xb9   :  { %297 = vmatmul.f32.vlgmr.msra.gmra.mxu2 %v243_v24  ;;  %v244_v62 = vand.u32 4294901760, %v243_v24  ;;  %735 = vset.pattern.permute.xlu1 %v548_v54 }
  0xba   :  { %499 = vmatpush.msra.mxu2 %v424_v26 }
  0xbb   :  { %321 = vmatmul.f32.vlgmr.msra.gmra.mxu3 %v244_v62  ;;  %v245_v57 = vsub.f32 %v243_v24, %v244_v62  ;;  %v561_v62 = vadd.s32 16, %v548_v54 }
  0xbc   :  { %521 = vmatpush.msra.mxu3 %v396_v63 }
  0xbd   :  { %v246_v25 = vand.u32 4294901760, %v245_v57  ;;  %v555_v57 = vadd.s32 8, %v548_v54  ;;  %737 = vset.pattern.permute.xlu0 %v561_v62 }
  0xbf   :  { %247 = vmatmul.f32.vlgmr.msra.gmra.mxu0 %v246_v25  ;;  %367 = vmatmul.f32.vlgmr.msrb.gmra.mxu1 %v242_v50 }
  0xc0   :  { %450 = vmatpush.msra.mxu0 %v423_v15  ;;  %736 = vset.pattern.permute.xlu2 %v555_v57 }
  0xc7   :  { %345 = vmatmul.f32.vlgmr.msrb.gmra.mxu0 %v242_v50 }
 0x134   :  { %v274_v42 = vpop.f32.mrf.mxu1 }
 0x13c   :  { %v248_v8 = vpop.f32.mrf.mxu0  ;;  %v298_v34 = vpop.f32.mrf.mxu2 }
 0x13d   :  { %v275_v44 = vadd.f32 %v274_v42, %v248_v8  ;;  %v368_v53 = vpop.f32.mrf.mxu1 }
 0x13e   :  { %v322_v52 = vpop.f32.mrf.mxu3 }
 0x13f   :  { %v299_v47 = vadd.f32 %v298_v34, %v275_v44 }
 0x141   :  { %v323_v51 = vadd.f32 %v322_v52, %v299_v47 }
 0x144   :  { %v346_v16 = vpop.f32.mrf.mxu0 }
 0x145   :  { %v347_v43 = vadd.f32 %v346_v16, %v323_v51 }
 0x147   :  { %v369_v3 = vadd.f32 %v368_v53, %v347_v43 }
 0x149   :  { %v371_v55 = vmax.f32 %v369_v3, 0.0 }
 0x14b   :  { %v375_v58 = vsel %vm373_vm10, %v371_v55, 0 }
 0x14c   :  { %v398_v59 = vand.u32 4294901760, %v375_v58 }
 0x14e   :  { %v399_v60 = vsub.f32 %v375_v58, %v398_v59  ;;  %429 = vmatmul.f32.vlgmr.msrb.gmra.mxu3 %v398_v59 }
 0x150   :  { %453 = vmatmul.f32.vlgmr.msra.gmra.mxu0 %v399_v60  ;;  %v400_v7 = vand.u32 4294901760, %v399_v60 }
 0x152   :  { %477 = vmatmul.f32.vlgmr.msra.gmra.mxu1 %v400_v7  ;;  %v401_v56 = vsub.f32 %v399_v60, %v400_v7  ;;  %v573_v60 = vadd.s32 32, %v548_v54 }
 0x154   :  { %v402_v32 = vand.u32 4294901760, %v401_v56  ;;  %v585_v56 = vadd.s32 48, %v548_v54 }
 0x156   :  { %403 = vmatmul.f32.vlgmr.msrb.gmra.mxu2 %v402_v32  ;;  %523 = vmatmul.f32.vlgmr.msra.gmra.mxu3 %v398_v59  ;;  %v579_v32 = vadd.s32 40, %v548_v54 }
 0x15e   :  { %501 = vmatmul.f32.vlgmr.msra.gmra.mxu2 %v398_v59  ;;  %v567_v59 = vadd.s32 24, %v548_v54 }
 0x1cd   :  { %v454_v24 = vpop.f32.mrf.mxu0 }
 0x1cf   :  { %v478_v17 = vpop.f32.mrf.mxu1 }
 0x1d1   :  { %v430_v31 = vpop.f32.mrf.mxu3 }
 0x1d9   :  { %v404_v48 = vpop.f32.mrf.mxu2  ;;  %v524_v26 = vpop.f32.mrf.mxu3 }
 0x1da   :  { %v431_v50 = vadd.f32 %v430_v31, %v404_v48  ;;  %v591_v31 = vadd.s32 56, %v548_v54 }
 0x1dc   :  { %v455_v25 = vadd.f32 %v454_v24, %v431_v50 }
 0x1de   :  { %v479_v61 = vadd.f32 %v478_v17, %v455_v25 }
 0x1e1   :  { %v502_v63 = vpop.f32.mrf.mxu2 }
 0x1e2   :  { %v503_v15 = vadd.f32 %v502_v63, %v479_v61 }
 0x1e4   :  { %v525_v33 = vadd.f32 %v524_v26, %v503_v15 }
 0x1e6   :  { %v728_v35 = vmul.f32 -1.442695, %v525_v33 }
 0x1e8   :  { %752 = vpow2.f32 %v728_v35 }
 0x1ee   :  { %v753_v42 = vpop.eup %752 }
 0x1ef   :  { %v530_v8 = vadd.f32 1.0, %v753_v42 }
 0x1f1   :  { %754 = vrcp.f32 %v530_v8  ;;  %v542_v52 = vand.u32 2147483648, %v530_v8  ;;  %v540_v16 = vand.u32 2147483647, %v530_v8  ;;  %vm536_vm12 = vweird.f32 %v530_v8 }
 0x1f3   :  { %v543_v53 = vor.u32 1.1754944e-38, %v542_v52  ;;  %vm541_vm14 = vcmp.eq.f32.partialorder %v540_v16, 8.507059e+37 }
 0x1f7   :  { %v755_v44 = vpop.eup %754 }
 0x1f8   :  { %v532_v34 = vmul.f32 %v755_v44, %v530_v8  ;;  %vm537_vm11 = vweird.f32 %v755_v44 }
 0x1f9   :  { %vm538_vm13 = vmor %vm536_vm12, %vm537_vm11 }
 0x1fa   :  { %v533_v47 = vsub.f32 1.0, %v532_v34 }
 0x1fc   :  { %v534_v51 = vmul.f32 %v755_v44, %v533_v47 }
 0x1fe   :  { %v535_v43 = vadd.f32 %v755_v44, %v534_v51  ;;  %v1053_v51 = vld [vmem:[#allocation13_spill] sm:$0xff] }
 0x200   :  { %v539_v3 = vsel %vm538_vm13, %v755_v44, %v535_v43 }
 0x201   :  { %v544_v55 = vsel %vm541_vm14, %v543_v53, %v539_v3 }
 0x202   :  { %v546_v58 = vperm.slane %v544_v55, 0  ;;  %v595_v7 = vperm.slane %v544_v55, 1 }
 0x204   :  { %563 = vperm.xlu0 %737, %v546_v58   ;;  %557 = vperm.xlu2 %736, %v546_v58  }
 0x205   :  { %551 = vperm.xlu1 %735, %v546_v58  }
 0x20c   :  { %744 = vset.pattern.permute.xlu0 %v555_v57  ;;  %738 = vset.pattern.permute.xlu2 %v567_v59 }
 0x20d   :  { %739 = vset.pattern.permute.xlu1 %v573_v60 }
 0x214   :  { %606 = vperm.xlu0 %744, %v595_v7   ;;  %569 = vperm.xlu2 %738, %v546_v58  }
 0x215   :  { %575 = vperm.xlu1 %739, %v546_v58  }
 0x21c   :  { %749 = vset.pattern.permute.xlu0 %v585_v56  ;;  %740 = vset.pattern.permute.xlu2 %v579_v32 }
 0x21d   :  { %741 = vset.pattern.permute.xlu1 %v585_v56 }
 0x224   :  { %636 = vperm.xlu0 %749, %v595_v7   ;;  %581 = vperm.xlu2 %740, %v546_v58  }
 0x225   :  { %587 = vperm.xlu1 %741, %v546_v58  }
 0x22c   :  { %742 = vset.pattern.permute.xlu2 %v591_v31  ;;  %751 = vset.pattern.permute.xlu0 %v591_v31 }
 0x22d   :  { %743 = vset.pattern.permute.xlu1 %v548_v54 }
 0x234   :  { %593 = vperm.xlu2 %742, %v546_v58  }
 0x235   :  { %600 = vperm.xlu1 %743, %v595_v7  }
 0x23c   :  { %745 = vset.pattern.permute.xlu2 %v561_v62 }
 0x23d   :  { %746 = vset.pattern.permute.xlu1 %v567_v59 }
 0x244   :  { %612 = vperm.xlu2 %745, %v595_v7  }
 0x245   :  { %618 = vperm.xlu1 %746, %v595_v7  }
 0x24c   :  { %747 = vset.pattern.permute.xlu2 %v573_v60 }
 0x24d   :  { %748 = vset.pattern.permute.xlu1 %v579_v32 }
 0x254   :  { %624 = vperm.xlu2 %747, %v595_v7  }
 0x255   :  { %630 = vperm.xlu1 %748, %v595_v7  }
 0x25c   :  { %750 = vset.pattern.permute.xlu2 %v591_v31 }
 0x25e   :  { %v558_v48 = vpop.permute.xlu2 %557 }
 0x25f   :  { %v646_v49 = vmul.f32 %v558_v48, %v918_v11  ;;  %v647_v50 = vmul.f32 %v558_v48, %v920_v12 }
 0x261   :  { %678 = vst [vmem:[#allocation8 + $0x10] sm:$0xff] %v646_v49 }
 0x262   :  { %679 = vst [vmem:[#allocation8 + $0x18] sm:$0xff] %v647_v50 }
 0x264   :  { %642 = vperm.xlu2 %750, %v595_v7  }
 0x26e   :  { %v570_v54 = vpop.permute.xlu2 %569 }
 0x26f   :  { %v650_v24 = vmul.f32 %v570_v54, %v936_v20  ;;  %v651_v62 = vmul.f32 %v570_v54, %v938_v21 }
 0x271   :  { %682 = vst [vmem:[#allocation8 + $0x30] sm:$0xff] %v650_v24 }
 0x272   :  { %683 = vst [vmem:[#allocation8 + $0x38] sm:$0xff] %v651_v62 }
 0x276   :  { %v564_v57 = vpop.permute.xlu0 %563 }
 0x277   :  { %v648_v25 = vmul.f32 %v564_v57, %v906_v5  ;;  %v649_v17 = vmul.f32 %v564_v57, %v908_v6  ;;  %v552_v61 = vpop.permute.xlu1 %551 }
 0x278   :  { %v644_v11 = vmul.f32 %v552_v61, %v900_v2  ;;  %v645_v12 = vmul.f32 %v552_v61, %v904_v4 }
 0x279   :  { %680 = vst [vmem:[#allocation8 + $0x20] sm:$0xff] %v648_v25 }
 0x27a   :  { %681 = vst [vmem:[#allocation8 + $0x28] sm:$0xff] %v649_v17 }
 0x27b   :  { %676 = vst [vmem:[#allocation8] sm:$0xff] %v644_v11 }
 0x27c   :  { %677 = vst [vmem:[#allocation8 + $0x8] sm:$0xff] %v645_v12 }
 0x27e   :  { %v582_v63 = vpop.permute.xlu2 %581 }
 0x27f   :  { %v654_v20 = vmul.f32 %v582_v63, %v950_v27  ;;  %v655_v21 = vmul.f32 %v582_v63, %v952_v28 }
 0x281   :  { %686 = vst [vmem:[#allocation8 + $0x50] sm:$0xff] %v654_v20 }
 0x282   :  { %687 = vst [vmem:[#allocation8 + $0x58] sm:$0xff] %v655_v21 }
 0x286   :  { %v607_v15 = vpop.permute.xlu0 %606 }
 0x287   :  { %v662_v5 = vmul.f32 %v607_v15, %v914_v9  ;;  %v663_v6 = vmul.f32 %v607_v15, %v916_v10  ;;  %v576_v26 = vpop.permute.xlu1 %575 }
 0x288   :  { %v652_v2 = vmul.f32 %v576_v26, %v940_v22  ;;  %v653_v4 = vmul.f32 %v576_v26, %v942_v23 }
 0x289   :  { %694 = vst [vmem:[#allocation8 + $0x90] sm:$0xff] %v662_v5 }
 0x28a   :  { %695 = vst [vmem:[#allocation8 + $0x98] sm:$0xff] %v663_v6 }
 0x28b   :  { %684 = vst [vmem:[#allocation8 + $0x40] sm:$0xff] %v652_v2 }
 0x28c   :  { %685 = vst [vmem:[#allocation8 + $0x48] sm:$0xff] %v653_v4 }
 0x28e   :  { %v594_v33 = vpop.permute.xlu2 %593 }
 0x28f   :  { %v658_v27 = vmul.f32 %v594_v33, %v976_v40  ;;  %v659_v28 = vmul.f32 %v594_v33, %v978_v41 }
 0x291   :  { %690 = vst [vmem:[#allocation8 + $0x70] sm:$0xff] %v658_v27 }
 0x292   :  { %691 = vst [vmem:[#allocation8 + $0x78] sm:$0xff] %v659_v28 }
 0x296   :  { %v637_v35 = vpop.permute.xlu0 %636 }
 0x297   :  { %v672_v9 = vmul.f32 %v637_v35, %v968_v36  ;;  %v673_v10 = vmul.f32 %v637_v35, %v970_v37  ;;  %v588_v42 = vpop.permute.xlu1 %587 }
 0x298   :  { %v656_v22 = vmul.f32 %v588_v42, %v972_v38  ;;  %v657_v23 = vmul.f32 %v588_v42, %v974_v39 }
 0x299   :  { %704 = vst [vmem:[#allocation8 + $0xe0] sm:$0xff] %v672_v9 }
 0x29a   :  { %705 = vst [vmem:[#allocation8 + $0xe8] sm:$0xff] %v673_v10 }
 0x29b   :  { %688 = vst [vmem:[#allocation8 + $0x60] sm:$0xff] %v656_v22 }
 0x29c   :  { %689 = vst [vmem:[#allocation8 + $0x68] sm:$0xff] %v657_v23 }
 0x29e   :  { %v613_v8 = vpop.permute.xlu2 %612 }
 0x29f   :  { %v664_v40 = vmul.f32 %v613_v8, %v922_v13  ;;  %v665_v41 = vmul.f32 %v613_v8, %v924_v14 }
 0x2a1   :  { %696 = vst [vmem:[#allocation8 + $0xa0] sm:$0xff] %v664_v40 }
 0x2a2   :  { %697 = vst [vmem:[#allocation8 + $0xa8] sm:$0xff] %v665_v41 }
 0x2a7   :  { %v601_v44 = vpop.permute.xlu1 %600 }
 0x2a8   :  { %v660_v36 = vmul.f32 %v601_v44, %v896_v0  ;;  %v661_v37 = vmul.f32 %v601_v44, %v898_v1 }
 0x2aa   :  { %692 = vst [vmem:[#allocation8 + $0x80] sm:$0xff] %v660_v36 }
 0x2ab   :  { %693 = vst [vmem:[#allocation8 + $0x88] sm:$0xff] %v661_v37 }
 0x2ae   :  { %v625_v38 = vpop.permute.xlu2 %624 }
 0x2af   :  { %v668_v39 = vmul.f32 %v625_v38, %v954_v29  ;;  %v669_v34 = vmul.f32 %v625_v38, %v956_v30  ;;  %v1052_v30 = vld [vmem:[#allocation12_spill] sm:$0xff] }
 0x2b1   :  { %700 = vst [vmem:[#allocation8 + $0xc0] sm:$0xff] %v668_v39 }
 0x2b2   :  { %701 = vst [vmem:[#allocation8 + $0xc8] sm:$0xff] %v669_v34 }
 0x2b7   :  { %v619_v47 = vpop.permute.xlu1 %618 }
 0x2b8   :  { %v666_v13 = vmul.f32 %v619_v47, %v932_v18  ;;  %v667_v14 = vmul.f32 %v619_v47, %v934_v19 }
 0x2ba   :  { %698 = vst [vmem:[#allocation8 + $0xb0] sm:$0xff] %v666_v13 }
 0x2bb   :  { %699 = vst [vmem:[#allocation8 + $0xb8] sm:$0xff] %v667_v14 }
 0x2be   :  { %v643_v52 = vpop.permute.xlu2 %642 }
 0x2bf   :  { %v674_v0 = vmul.f32 %v643_v52, %v986_v45  ;;  %v675_v1 = vmul.f32 %v643_v52, %v988_v46 }
 0x2c1   :  { %706 = vst [vmem:[#allocation8 + $0xf0] sm:$0xff] %v674_v0 }
 0x2c2   :  { %707 = vst [vmem:[#allocation8 + $0xf8] sm:$0xff] %v675_v1 }
 0x2c7   :  { %v631_v29 = vpop.permute.xlu1 %630 }
 0x2c8   :  { %v670_v18 = vmul.f32 %v631_v29, %v1052_v30  ;;  %v671_v19 = vmul.f32 %v631_v29, %v1053_v51 }
 0x2ca   :  { %702 = vst [vmem:[#allocation8 + $0xd0] sm:$0xff] %v670_v18 }
 0x2cb   :  { %703 = vst [vmem:[#allocation8 + $0xd8] sm:$0xff] %v671_v19 }
 0x2cc   :  { %720 = dma.vmem_to_hbm [thread:$0]  %s713_s2, 4096, %s715_s30, [#allocation4], %s860_s22, %s860_s22, %s861_s23  }
 0x2cd   :  { %856 = dma.done.wait [#allocation4], 4096  }
 0x2ce   :  { %857 = vsyncadd [#allocation4], 4294963200 }
 0x2cf   :  { %725 = vsyncpa [#allocation3], 1 }
 0x2d0   :  { %726 = vsyncpa [#allocation6], 1 }
 0x2d1   :  { %727 = vsyncpa [#allocation4], 1 }

</bundles_post_ra>
